<compile_context>
chip_gen: v5e
topology: v5e:2x2
jax: 0.10.0
libtpu: 0.0.40
codegen_flags: <defaults>
</compile_context>

<pallas_src>
import jax
import jax.numpy as jnp
from jax.experimental import pallas as pl
from jax.experimental.pallas import tpu as pltpu

# --- model dims (from the PyTorch module) ---
HIDDEN_N = 5
HIDDEN_SIZE = 10
INPUT_N = HIDDEN_SIZE
K = 2
Q_SIZE = 200
OUTPUT_SIZE = Q_SIZE
OUT_PAD = 256            # lane-dense (multiple of 128) output tile width
C_REC = 2 * K            # recon starts at column 4 of the fused output; cols 0:4 = [mu|lv]

# --- packed parameter blob layout: (P_ROWS, OUT_PAD) f32, 8-row aligned sections ----
A_W1 = 0                 # rows  0..9  : fc1 weight   (INPUT_N, HIDDEN_N)
A_B1 = 16                # row   16    : fc1 bias     (1, HIDDEN_N)
A_WE = 24                # rows 24..28 : fc21|fc22    (HIDDEN_N, 2K) fused
A_BE = 32                # row   32    : fused bias   (1, 2K)
A_W3 = 40                # rows 40..41 : fc3 weight   (K, HIDDEN_N)
A_B3 = 48                # row   48    : fc3 bias     (1, HIDDEN_N)
A_W4 = 56                # rows 56..60 : fc4 weight   (HIDDEN_N, OUTPUT_SIZE) at cols 4:204
A_B4 = 64                # row   64    : fc4 bias     (1, OUTPUT_SIZE) at cols 4:204
P_ROWS = 72              # 72 x 256 f32 ~= 72 KiB, resident across the grid


def _round_up(n, m):
    return ((n + m - 1) // m) * m


def _affine_vpu(a, w, b):
    """a @ w + b with the contraction unrolled as VPU broadcast-FMAs.

    a: (TB, n_in), w: (n_in, n_out), b: (1, n_out) -> (TB, n_out), all f32.
    Contraction dims here are 2/5/10, so the MXU would be <4% utilized and every dot
    would force a relayout of the narrow weight slice; a handful of VALU FMAs hide
    under the EUP/store-bound decoder path instead.
    """
    n_in = w.shape[0]
    acc = a[:, 0:1] * w[0:1, :]
    for j in range(1, n_in):
        acc = acc + a[:, j:j + 1] * w[j:j + 1, :]
    return acc + b


def vae_kernel(xe_ref, p_ref, out_ref):
    """One batch tile: xe = [x | eps] (TB, 12), params blob (72, 256), out (TB, 256)."""
    x = xe_ref[:, 0:INPUT_N]                         # (TB, 10)
    eps = xe_ref[:, INPUT_N:INPUT_N + K]             # (TB, 2)

    # ---- encoder: h = relu(fc1(x)) --------------------------------------------------
    w1 = p_ref[A_W1:A_W1 + INPUT_N, 0:HIDDEN_N]      # (10, 5)
    b1 = p_ref[A_B1:A_B1 + 1, 0:HIDDEN_N]            # (1, 5)
    h = jnp.maximum(_affine_vpu(x, w1, b1), 0.0)

    # ---- fused fc21|fc22: enc = relu(h @ [W21|W22] + [b21|b22]) => [mu | log_var] ----
    w_enc = p_ref[A_WE:A_WE + HIDDEN_N, 0:2 * K]     # (5, 4)
    b_enc = p_ref[A_BE:A_BE + 1, 0:2 * K]            # (1, 4)
    enc = jnp.maximum(_affine_vpu(h, w_enc, b_enc), 0.0)   # (TB, 4)
    mu = enc[:, 0:K]
    log_var = enc[:, K:2 * K]

    # ---- reparametrization: z = eps * exp(0.5 * log_var) + mu -----------------------
    z = eps * jnp.exp(0.5 * log_var) + mu            # (TB, 2)

    # ---- decoder: recon = sigmoid(fc4(relu(fc3(z)))) ---------------------------------
    w3 = p_ref[A_W3:A_W3 + K, 0:HIDDEN_N]            # (2, 5)
    b3 = p_ref[A_B3:A_B3 + 1, 0:HIDDEN_N]            # (1, 5)
    h3 = jnp.maximum(_affine_vpu(z, w3, b3), 0.0)

    w4 = p_ref[A_W4:A_W4 + HIDDEN_N, :]              # (5, 256); real cols are 4:204
    b4 = p_ref[A_B4:A_B4 + 1, :]                     # (1, 256)
    logits = _affine_vpu(h3, w4, b4)                 # (TB, 256)
    # exact sigmoid via tanh: one EUP push/element (exp + rcp would be two on one slot)
    recon = 0.5 * jnp.tanh(0.5 * logits) + 0.5

    out_ref[...] = recon                             # lane-dense (TB, 256) store
    out_ref[:, 0:2 * K] = enc                        # fold [mu | log_var] into cols 0:4


def pack_params(params):
    """Pack the 10 per-layer arrays (weights pre-transposed to (in, out)) into one blob."""
    (w1, b1, w21, b21, w22, b22, w3, b3, w4, b4) = params
    blob = jnp.zeros((P_ROWS, OUT_PAD), jnp.float32)
    blob = blob.at[A_W1:A_W1 + INPUT_N, 0:HIDDEN_N].set(w1)
    blob = blob.at[A_B1, 0:HIDDEN_N].set(b1.reshape(-1))
    blob = blob.at[A_WE:A_WE + HIDDEN_N, 0:2 * K].set(
        jnp.concatenate([w21, w22], axis=1))
    blob = blob.at[A_BE, 0:2 * K].set(
        jnp.concatenate([b21.reshape(-1), b22.reshape(-1)]))
    blob = blob.at[A_W3:A_W3 + K, 0:HIDDEN_N].set(w3)
    blob = blob.at[A_B3, 0:HIDDEN_N].set(b3.reshape(-1))
    # fc4 lives at output columns 4:204 so the fused [mu|lv]|recon output is lane-dense.
    blob = blob.at[A_W4:A_W4 + HIDDEN_N, C_REC:C_REC + OUTPUT_SIZE].set(w4)
    blob = blob.at[A_B4, C_REC:C_REC + OUTPUT_SIZE].set(b4.reshape(-1))
    return blob


def vae_forward(x, eps, params, *, tb=None):
    B = x.shape[0]
    # Large batch tile to amortize per-grid-step overhead; ceil(B/2) keeps >=2 grid
    # steps for large batches so v7x megacore ("parallel") can split across both TCs.
    # At tb=2048 the pipeline buffers + in-kernel temps stay well under the 32 MiB
    # scoped-VMEM limit requested below (v7x physical VMEM is 64 MiB per TC).
    if tb is None:
        tb = min(2048, _round_up(max((B + 1) // 2, 1), 8))
    b_pad = _round_up(B, tb)

    xe = jnp.concatenate([x, eps], axis=1)           # (B, 12) single input DMA
    if b_pad != B:
        xe = jnp.pad(xe, ((0, b_pad - B), (0, 0)))

    blob = pack_params(params)
    grid = (b_pad // tb,)

    flops = 2 * b_pad * (INPUT_N * HIDDEN_N + HIDDEN_N * 2 * K
                         + K * HIDDEN_N + HIDDEN_N * OUT_PAD)
    transcendentals = b_pad * (K + OUT_PAD)          # exp for std, tanh for sigmoid
    bytes_accessed = (b_pad * (INPUT_N + K) * 4      # xe in
                      + b_pad * OUT_PAD * 4          # fused out
                      + P_ROWS * OUT_PAD * 4)        # params blob
    cost = pl.CostEstimate(flops=flops,
                           transcendentals=transcendentals,
                           bytes_accessed=bytes_accessed)

    out = pl.pallas_call(
        vae_kernel,
        out_shape=jax.ShapeDtypeStruct((b_pad, OUT_PAD), jnp.float32),
        grid=grid,
        in_specs=[
            pl.BlockSpec((tb, INPUT_N + K), lambda i: (i, 0)),     # [x | eps] tile
            pl.BlockSpec((P_ROWS, OUT_PAD), lambda i: (0, 0)),     # params blob (resident)
        ],
        out_specs=pl.BlockSpec((tb, OUT_PAD), lambda i: (i, 0)),   # [mu|lv | recon | pad]
        compiler_params=pltpu.CompilerParams(
            dimension_semantics=("parallel",),
            vmem_limit_bytes=32 * 1024 * 1024),
        cost_estimate=cost,
    )(xe, blob)

    mu = out[:B, 0:K]
    log_var = out[:B, K:2 * K]
    recon = out[:B, C_REC:C_REC + OUTPUT_SIZE]
    return recon, mu, log_var


def init_params(key):
    """Deterministic init mimicking nn.Linear's U(-1/sqrt(fan_in), 1/sqrt(fan_in)).
    Weights stored pre-transposed as (in, out); biases as (1, out)."""
    def linear(key, fan_in, fan_out):
        kw, kb = jax.random.split(key)
        bound = 1.0 / jnp.sqrt(fan_in)
        w = jax.random.uniform(kw, (fan_in, fan_out), jnp.float32, -bound, bound)
        b = jax.random.uniform(kb, (1, fan_out), jnp.float32, -bound, bound)
        return w, b

    k1, k2, k3, k4, k5 = jax.random.split(key, 5)
    w1, b1 = linear(k1, INPUT_N, HIDDEN_N)      # fc1
    w21, b21 = linear(k2, HIDDEN_N, K)          # fc21
    w22, b22 = linear(k3, HIDDEN_N, K)          # fc22
    w3, b3 = linear(k4, K, HIDDEN_N)            # fc3
    w4, b4 = linear(k5, HIDDEN_N, OUTPUT_SIZE)  # fc4
    return (w1, b1, w21, b21, w22, b22, w3, b3, w4, b4)


def reference_forward(x, eps, params):
    (w1, b1, w21, b21, w22, b22, w3, b3, w4, b4) = params
    h = jax.nn.relu(x @ w1 + b1)
    mu = jax.nn.relu(h @ w21 + b21)
    log_var = jax.nn.relu(h @ w22 + b22)
    std = jnp.exp(0.5 * log_var)
    z = eps * std + mu
    h3 = jax.nn.relu(z @ w3 + b3)
    recon = jax.nn.sigmoid(h3 @ w4 + b4)
    return recon, mu, log_var


def _check(B, key):
    k_x, k_eps = jax.random.split(key)
    x = jax.random.normal(k_x, (B, INPUT_N), jnp.float32)
    eps = jax.random.normal(k_eps, (B, K), jnp.float32)
    params = init_params(jax.random.PRNGKey(0))

    recon, mu, log_var = vae_forward(x, eps, params)
    jax.block_until_ready((recon, mu, log_var))

    r_ref, mu_ref, lv_ref = reference_forward(x, eps, params)
    assert recon.shape == (B, OUTPUT_SIZE)
    assert jnp.allclose(recon, r_ref, atol=1e-5, rtol=1e-5)
    assert jnp.allclose(mu, mu_ref, atol=1e-5, rtol=1e-5)
    assert jnp.allclose(log_var, lv_ref, atol=1e-5, rtol=1e-5)


if __name__ == "__main__":
    key = jax.random.PRNGKey(0)
    k_a, k_b = jax.random.split(key)
    _check(8, k_a)    # single grid step
    _check(20, k_b)   # exercises batch padding + 2-step grid
    print("KERNEL_OK")
</pallas_src>

<mosaic_0001>
module attributes {stable_mosaic.version = 11 : i64} {
  func.func @vae_kernel(%arg0: i32, %arg1: memref<8x12xf32, #tpu.memory_space<vmem>>, %arg2: memref<72x256xf32, #tpu.memory_space<vmem>>, %arg3: memref<8x256xf32, #tpu.memory_space<vmem>>) attributes {dimension_semantics = [#tpu.dimension_semantics<parallel>], iteration_bounds = array<i64: 1>, scalar_prefetch = 0 : i64, scratch_operands = 0 : i64, tpu.core_type = #tpu.core_type<tc>, window_params = [{transform_indices = @transform_0, window_bounds = array<i64: 8, 12>}, {pipeline_mode = #tpu.pipeline_mode<synchronous>, transform_indices = @transform_1, window_bounds = array<i64: 72, 256>}, {transform_indices = @transform_2, window_bounds = array<i64: 8, 256>}]} {
    %c0 = arith.constant 0 : index
    %c0_0 = arith.constant 0 : index
    %0 = vector.load %arg1[%c0, %c0_0] : memref<8x12xf32, #tpu.memory_space<vmem>>, vector<8x10xf32>
    %c0_1 = arith.constant 0 : index
    %c10 = arith.constant 10 : index
    %1 = vector.load %arg1[%c0_1, %c10] : memref<8x12xf32, #tpu.memory_space<vmem>>, vector<8x2xf32>
    %c0_2 = arith.constant 0 : index
    %c0_3 = arith.constant 0 : index
    %2 = vector.load %arg2[%c0_2, %c0_3] : memref<72x256xf32, #tpu.memory_space<vmem>>, vector<10x5xf32>
    %c16 = arith.constant 16 : index
    %c0_4 = arith.constant 0 : index
    %3 = vector.load %arg2[%c16, %c0_4] : memref<72x256xf32, #tpu.memory_space<vmem>>, vector<1x5xf32>
    %4 = vector.extract_strided_slice %0 {offsets = [0, 0], sizes = [8, 1], strides = [1, 1]} : vector<8x10xf32> to vector<8x1xf32>
    %5 = vector.extract_strided_slice %2 {offsets = [0, 0], sizes = [1, 5], strides = [1, 1]} : vector<10x5xf32> to vector<1x5xf32>
    %6 = vector.broadcast %4 : vector<8x1xf32> to vector<8x5xf32>
    %7 = vector.broadcast %5 : vector<1x5xf32> to vector<8x5xf32>
    %8 = arith.mulf %6, %7 : vector<8x5xf32>
    %9 = vector.extract_strided_slice %0 {offsets = [0, 1], sizes = [8, 1], strides = [1, 1]} : vector<8x10xf32> to vector<8x1xf32>
    %10 = vector.extract_strided_slice %2 {offsets = [1, 0], sizes = [1, 5], strides = [1, 1]} : vector<10x5xf32> to vector<1x5xf32>
    %11 = vector.broadcast %9 : vector<8x1xf32> to vector<8x5xf32>
    %12 = vector.broadcast %10 : vector<1x5xf32> to vector<8x5xf32>
    %13 = arith.mulf %11, %12 : vector<8x5xf32>
    %14 = arith.addf %8, %13 : vector<8x5xf32>
    %15 = vector.extract_strided_slice %0 {offsets = [0, 2], sizes = [8, 1], strides = [1, 1]} : vector<8x10xf32> to vector<8x1xf32>
    %16 = vector.extract_strided_slice %2 {offsets = [2, 0], sizes = [1, 5], strides = [1, 1]} : vector<10x5xf32> to vector<1x5xf32>
    %17 = vector.broadcast %15 : vector<8x1xf32> to vector<8x5xf32>
    %18 = vector.broadcast %16 : vector<1x5xf32> to vector<8x5xf32>
    %19 = arith.mulf %17, %18 : vector<8x5xf32>
    %20 = arith.addf %14, %19 : vector<8x5xf32>
    %21 = vector.extract_strided_slice %0 {offsets = [0, 3], sizes = [8, 1], strides = [1, 1]} : vector<8x10xf32> to vector<8x1xf32>
    %22 = vector.extract_strided_slice %2 {offsets = [3, 0], sizes = [1, 5], strides = [1, 1]} : vector<10x5xf32> to vector<1x5xf32>
    %23 = vector.broadcast %21 : vector<8x1xf32> to vector<8x5xf32>
    %24 = vector.broadcast %22 : vector<1x5xf32> to vector<8x5xf32>
    %25 = arith.mulf %23, %24 : vector<8x5xf32>
    %26 = arith.addf %20, %25 : vector<8x5xf32>
    %27 = vector.extract_strided_slice %0 {offsets = [0, 4], sizes = [8, 1], strides = [1, 1]} : vector<8x10xf32> to vector<8x1xf32>
    %28 = vector.extract_strided_slice %2 {offsets = [4, 0], sizes = [1, 5], strides = [1, 1]} : vector<10x5xf32> to vector<1x5xf32>
    %29 = vector.broadcast %27 : vector<8x1xf32> to vector<8x5xf32>
    %30 = vector.broadcast %28 : vector<1x5xf32> to vector<8x5xf32>
    %31 = arith.mulf %29, %30 : vector<8x5xf32>
    %32 = arith.addf %26, %31 : vector<8x5xf32>
    %33 = vector.extract_strided_slice %0 {offsets = [0, 5], sizes = [8, 1], strides = [1, 1]} : vector<8x10xf32> to vector<8x1xf32>
    %34 = vector.extract_strided_slice %2 {offsets = [5, 0], sizes = [1, 5], strides = [1, 1]} : vector<10x5xf32> to vector<1x5xf32>
    %35 = vector.broadcast %33 : vector<8x1xf32> to vector<8x5xf32>
    %36 = vector.broadcast %34 : vector<1x5xf32> to vector<8x5xf32>
    %37 = arith.mulf %35, %36 : vector<8x5xf32>
    %38 = arith.addf %32, %37 : vector<8x5xf32>
    %39 = vector.extract_strided_slice %0 {offsets = [0, 6], sizes = [8, 1], strides = [1, 1]} : vector<8x10xf32> to vector<8x1xf32>
    %40 = vector.extract_strided_slice %2 {offsets = [6, 0], sizes = [1, 5], strides = [1, 1]} : vector<10x5xf32> to vector<1x5xf32>
    %41 = vector.broadcast %39 : vector<8x1xf32> to vector<8x5xf32>
    %42 = vector.broadcast %40 : vector<1x5xf32> to vector<8x5xf32>
    %43 = arith.mulf %41, %42 : vector<8x5xf32>
    %44 = arith.addf %38, %43 : vector<8x5xf32>
    %45 = vector.extract_strided_slice %0 {offsets = [0, 7], sizes = [8, 1], strides = [1, 1]} : vector<8x10xf32> to vector<8x1xf32>
    %46 = vector.extract_strided_slice %2 {offsets = [7, 0], sizes = [1, 5], strides = [1, 1]} : vector<10x5xf32> to vector<1x5xf32>
    %47 = vector.broadcast %45 : vector<8x1xf32> to vector<8x5xf32>
    %48 = vector.broadcast %46 : vector<1x5xf32> to vector<8x5xf32>
    %49 = arith.mulf %47, %48 : vector<8x5xf32>
    %50 = arith.addf %44, %49 : vector<8x5xf32>
    %51 = vector.extract_strided_slice %0 {offsets = [0, 8], sizes = [8, 1], strides = [1, 1]} : vector<8x10xf32> to vector<8x1xf32>
    %52 = vector.extract_strided_slice %2 {offsets = [8, 0], sizes = [1, 5], strides = [1, 1]} : vector<10x5xf32> to vector<1x5xf32>
    %53 = vector.broadcast %51 : vector<8x1xf32> to vector<8x5xf32>
    %54 = vector.broadcast %52 : vector<1x5xf32> to vector<8x5xf32>
    %55 = arith.mulf %53, %54 : vector<8x5xf32>
    %56 = arith.addf %50, %55 : vector<8x5xf32>
    %57 = vector.extract_strided_slice %0 {offsets = [0, 9], sizes = [8, 1], strides = [1, 1]} : vector<8x10xf32> to vector<8x1xf32>
    %58 = vector.extract_strided_slice %2 {offsets = [9, 0], sizes = [1, 5], strides = [1, 1]} : vector<10x5xf32> to vector<1x5xf32>
    %59 = vector.broadcast %57 : vector<8x1xf32> to vector<8x5xf32>
    %60 = vector.broadcast %58 : vector<1x5xf32> to vector<8x5xf32>
    %61 = arith.mulf %59, %60 : vector<8x5xf32>
    %62 = arith.addf %56, %61 : vector<8x5xf32>
    %63 = vector.broadcast %3 : vector<1x5xf32> to vector<8x5xf32>
    %64 = arith.addf %62, %63 : vector<8x5xf32>
    %cst = arith.constant 0.000000e+00 : f32
    %65 = vector.broadcast %cst : f32 to vector<8x5xf32>
    %66 = arith.maximumf %64, %65 : vector<8x5xf32>
    %c24 = arith.constant 24 : index
    %c0_5 = arith.constant 0 : index
    %67 = vector.load %arg2[%c24, %c0_5] : memref<72x256xf32, #tpu.memory_space<vmem>>, vector<5x4xf32>
    %c32 = arith.constant 32 : index
    %c0_6 = arith.constant 0 : index
    %68 = vector.load %arg2[%c32, %c0_6] : memref<72x256xf32, #tpu.memory_space<vmem>>, vector<1x4xf32>
    %69 = vector.extract_strided_slice %66 {offsets = [0, 0], sizes = [8, 1], strides = [1, 1]} : vector<8x5xf32> to vector<8x1xf32>
    %70 = vector.extract_strided_slice %67 {offsets = [0, 0], sizes = [1, 4], strides = [1, 1]} : vector<5x4xf32> to vector<1x4xf32>
    %71 = vector.broadcast %69 : vector<8x1xf32> to vector<8x4xf32>
    %72 = vector.broadcast %70 : vector<1x4xf32> to vector<8x4xf32>
    %73 = arith.mulf %71, %72 : vector<8x4xf32>
    %74 = vector.extract_strided_slice %66 {offsets = [0, 1], sizes = [8, 1], strides = [1, 1]} : vector<8x5xf32> to vector<8x1xf32>
    %75 = vector.extract_strided_slice %67 {offsets = [1, 0], sizes = [1, 4], strides = [1, 1]} : vector<5x4xf32> to vector<1x4xf32>
    %76 = vector.broadcast %74 : vector<8x1xf32> to vector<8x4xf32>
    %77 = vector.broadcast %75 : vector<1x4xf32> to vector<8x4xf32>
    %78 = arith.mulf %76, %77 : vector<8x4xf32>
    %79 = arith.addf %73, %78 : vector<8x4xf32>
    %80 = vector.extract_strided_slice %66 {offsets = [0, 2], sizes = [8, 1], strides = [1, 1]} : vector<8x5xf32> to vector<8x1xf32>
    %81 = vector.extract_strided_slice %67 {offsets = [2, 0], sizes = [1, 4], strides = [1, 1]} : vector<5x4xf32> to vector<1x4xf32>
    %82 = vector.broadcast %80 : vector<8x1xf32> to vector<8x4xf32>
    %83 = vector.broadcast %81 : vector<1x4xf32> to vector<8x4xf32>
    %84 = arith.mulf %82, %83 : vector<8x4xf32>
    %85 = arith.addf %79, %84 : vector<8x4xf32>
    %86 = vector.extract_strided_slice %66 {offsets = [0, 3], sizes = [8, 1], strides = [1, 1]} : vector<8x5xf32> to vector<8x1xf32>
    %87 = vector.extract_strided_slice %67 {offsets = [3, 0], sizes = [1, 4], strides = [1, 1]} : vector<5x4xf32> to vector<1x4xf32>
    %88 = vector.broadcast %86 : vector<8x1xf32> to vector<8x4xf32>
    %89 = vector.broadcast %87 : vector<1x4xf32> to vector<8x4xf32>
    %90 = arith.mulf %88, %89 : vector<8x4xf32>
    %91 = arith.addf %85, %90 : vector<8x4xf32>
    %92 = vector.extract_strided_slice %66 {offsets = [0, 4], sizes = [8, 1], strides = [1, 1]} : vector<8x5xf32> to vector<8x1xf32>
    %93 = vector.extract_strided_slice %67 {offsets = [4, 0], sizes = [1, 4], strides = [1, 1]} : vector<5x4xf32> to vector<1x4xf32>
    %94 = vector.broadcast %92 : vector<8x1xf32> to vector<8x4xf32>
    %95 = vector.broadcast %93 : vector<1x4xf32> to vector<8x4xf32>
    %96 = arith.mulf %94, %95 : vector<8x4xf32>
    %97 = arith.addf %91, %96 : vector<8x4xf32>
    %98 = vector.broadcast %68 : vector<1x4xf32> to vector<8x4xf32>
    %99 = arith.addf %97, %98 : vector<8x4xf32>
    %cst_7 = arith.constant 0.000000e+00 : f32
    %100 = vector.broadcast %cst_7 : f32 to vector<8x4xf32>
    %101 = arith.maximumf %99, %100 : vector<8x4xf32>
    %102 = vector.extract_strided_slice %101 {offsets = [0, 0], sizes = [8, 2], strides = [1, 1]} : vector<8x4xf32> to vector<8x2xf32>
    %103 = vector.extract_strided_slice %101 {offsets = [0, 2], sizes = [8, 2], strides = [1, 1]} : vector<8x4xf32> to vector<8x2xf32>
    %cst_8 = arith.constant 5.000000e-01 : f32
    %104 = vector.broadcast %cst_8 : f32 to vector<8x2xf32>
    %105 = arith.mulf %104, %103 : vector<8x2xf32>
    %106 = math.exp %105 : vector<8x2xf32>
    %107 = arith.mulf %1, %106 : vector<8x2xf32>
    %108 = arith.addf %107, %102 : vector<8x2xf32>
    %c40 = arith.constant 40 : index
    %c0_9 = arith.constant 0 : index
    %109 = vector.load %arg2[%c40, %c0_9] : memref<72x256xf32, #tpu.memory_space<vmem>>, vector<2x5xf32>
    %c48 = arith.constant 48 : index
    %c0_10 = arith.constant 0 : index
    %110 = vector.load %arg2[%c48, %c0_10] : memref<72x256xf32, #tpu.memory_space<vmem>>, vector<1x5xf32>
    %111 = vector.extract_strided_slice %108 {offsets = [0, 0], sizes = [8, 1], strides = [1, 1]} : vector<8x2xf32> to vector<8x1xf32>
    %112 = vector.extract_strided_slice %109 {offsets = [0, 0], sizes = [1, 5], strides = [1, 1]} : vector<2x5xf32> to vector<1x5xf32>
    %113 = vector.broadcast %111 : vector<8x1xf32> to vector<8x5xf32>
    %114 = vector.broadcast %112 : vector<1x5xf32> to vector<8x5xf32>
    %115 = arith.mulf %113, %114 : vector<8x5xf32>
    %116 = vector.extract_strided_slice %108 {offsets = [0, 1], sizes = [8, 1], strides = [1, 1]} : vector<8x2xf32> to vector<8x1xf32>
    %117 = vector.extract_strided_slice %109 {offsets = [1, 0], sizes = [1, 5], strides = [1, 1]} : vector<2x5xf32> to vector<1x5xf32>
    %118 = vector.broadcast %116 : vector<8x1xf32> to vector<8x5xf32>
    %119 = vector.broadcast %117 : vector<1x5xf32> to vector<8x5xf32>
    %120 = arith.mulf %118, %119 : vector<8x5xf32>
    %121 = arith.addf %115, %120 : vector<8x5xf32>
    %122 = vector.broadcast %110 : vector<1x5xf32> to vector<8x5xf32>
    %123 = arith.addf %121, %122 : vector<8x5xf32>
    %cst_11 = arith.constant 0.000000e+00 : f32
    %124 = vector.broadcast %cst_11 : f32 to vector<8x5xf32>
    %125 = arith.maximumf %123, %124 : vector<8x5xf32>
    %c56 = arith.constant 56 : index
    %c0_12 = arith.constant 0 : index
    %126 = vector.load %arg2[%c56, %c0_12] : memref<72x256xf32, #tpu.memory_space<vmem>>, vector<5x256xf32>
    %c64 = arith.constant 64 : index
    %c0_13 = arith.constant 0 : index
    %127 = vector.load %arg2[%c64, %c0_13] : memref<72x256xf32, #tpu.memory_space<vmem>>, vector<1x256xf32>
    %128 = vector.extract_strided_slice %125 {offsets = [0, 0], sizes = [8, 1], strides = [1, 1]} : vector<8x5xf32> to vector<8x1xf32>
    %129 = vector.extract_strided_slice %126 {offsets = [0, 0], sizes = [1, 256], strides = [1, 1]} : vector<5x256xf32> to vector<1x256xf32>
    %130 = vector.broadcast %128 : vector<8x1xf32> to vector<8x256xf32>
    %131 = vector.broadcast %129 : vector<1x256xf32> to vector<8x256xf32>
    %132 = arith.mulf %130, %131 : vector<8x256xf32>
    %133 = vector.extract_strided_slice %125 {offsets = [0, 1], sizes = [8, 1], strides = [1, 1]} : vector<8x5xf32> to vector<8x1xf32>
    %134 = vector.extract_strided_slice %126 {offsets = [1, 0], sizes = [1, 256], strides = [1, 1]} : vector<5x256xf32> to vector<1x256xf32>
    %135 = vector.broadcast %133 : vector<8x1xf32> to vector<8x256xf32>
    %136 = vector.broadcast %134 : vector<1x256xf32> to vector<8x256xf32>
    %137 = arith.mulf %135, %136 : vector<8x256xf32>
    %138 = arith.addf %132, %137 : vector<8x256xf32>
    %139 = vector.extract_strided_slice %125 {offsets = [0, 2], sizes = [8, 1], strides = [1, 1]} : vector<8x5xf32> to vector<8x1xf32>
    %140 = vector.extract_strided_slice %126 {offsets = [2, 0], sizes = [1, 256], strides = [1, 1]} : vector<5x256xf32> to vector<1x256xf32>
    %141 = vector.broadcast %139 : vector<8x1xf32> to vector<8x256xf32>
    %142 = vector.broadcast %140 : vector<1x256xf32> to vector<8x256xf32>
    %143 = arith.mulf %141, %142 : vector<8x256xf32>
    %144 = arith.addf %138, %143 : vector<8x256xf32>
    %145 = vector.extract_strided_slice %125 {offsets = [0, 3], sizes = [8, 1], strides = [1, 1]} : vector<8x5xf32> to vector<8x1xf32>
    %146 = vector.extract_strided_slice %126 {offsets = [3, 0], sizes = [1, 256], strides = [1, 1]} : vector<5x256xf32> to vector<1x256xf32>
    %147 = vector.broadcast %145 : vector<8x1xf32> to vector<8x256xf32>
    %148 = vector.broadcast %146 : vector<1x256xf32> to vector<8x256xf32>
    %149 = arith.mulf %147, %148 : vector<8x256xf32>
    %150 = arith.addf %144, %149 : vector<8x256xf32>
    %151 = vector.extract_strided_slice %125 {offsets = [0, 4], sizes = [8, 1], strides = [1, 1]} : vector<8x5xf32> to vector<8x1xf32>
    %152 = vector.extract_strided_slice %126 {offsets = [4, 0], sizes = [1, 256], strides = [1, 1]} : vector<5x256xf32> to vector<1x256xf32>
    %153 = vector.broadcast %151 : vector<8x1xf32> to vector<8x256xf32>
    %154 = vector.broadcast %152 : vector<1x256xf32> to vector<8x256xf32>
    %155 = arith.mulf %153, %154 : vector<8x256xf32>
    %156 = arith.addf %150, %155 : vector<8x256xf32>
    %157 = vector.broadcast %127 : vector<1x256xf32> to vector<8x256xf32>
    %158 = arith.addf %156, %157 : vector<8x256xf32>
    %cst_14 = arith.constant 5.000000e-01 : f32
    %159 = vector.broadcast %cst_14 : f32 to vector<8x256xf32>
    %160 = arith.mulf %159, %158 : vector<8x256xf32>
    %161 = math.tanh %160 : vector<8x256xf32>
    %cst_15 = arith.constant 5.000000e-01 : f32
    %162 = vector.broadcast %cst_15 : f32 to vector<8x256xf32>
    %163 = arith.mulf %162, %161 : vector<8x256xf32>
    %cst_16 = arith.constant 5.000000e-01 : f32
    %164 = vector.broadcast %cst_16 : f32 to vector<8x256xf32>
    %165 = arith.addf %163, %164 : vector<8x256xf32>
    %c0_17 = arith.constant 0 : index
    %c0_18 = arith.constant 0 : index
    %166 = vector.load %arg3[%c0_17, %c0_18] : memref<8x256xf32, #tpu.memory_space<vmem>>, vector<8x256xf32>
    tpu.vector_store %arg3[%c0_17, %c0_18], %165 {strides = array<i32>} : memref<8x256xf32, #tpu.memory_space<vmem>>, vector<8x256xf32>,
    %c0_19 = arith.constant 0 : index
    %c0_20 = arith.constant 0 : index
    %167 = vector.load %arg3[%c0_19, %c0_20] : memref<8x256xf32, #tpu.memory_space<vmem>>, vector<8x4xf32>
    tpu.vector_store %arg3[%c0_19, %c0_20], %101 {strides = array<i32>} : memref<8x256xf32, #tpu.memory_space<vmem>>, vector<8x4xf32>,
    return
  }
  func.func @transform_0(%arg0: i32) -> (i32, i32) {
    %c0_i32 = arith.constant 0 : i32
    %c0_i32_0 = arith.constant 0 : i32
    return %arg0, %c0_i32 : i32, i32
  }
  func.func @transform_1(%arg0: i32) -> (i32, i32) {
    %c0_i32 = arith.constant 0 : i32
    %c0_i32_0 = arith.constant 0 : i32
    %c0_i32_1 = arith.constant 0 : i32
    return %c0_i32, %c0_i32_0 : i32, i32
  }
  func.func @transform_2(%arg0: i32) -> (i32, i32) {
    %c0_i32 = arith.constant 0 : i32
    %c0_i32_0 = arith.constant 0 : i32
    return %arg0, %c0_i32 : i32, i32
  }
}

</mosaic_0001>

<bundles_post_ra>
// kernel: tpu_custom_call.1
= control target key start
LH: loop header
LB: loop body
LE: loop exit
PB: predicated region body
PF: predicated region fallthrough
CT: control target
= control target key end

     0   :  { %7 = vsyncpa [#allocation3], 0  ;;  %s479_s0 = inlined_call_operand.hbm [shape: f32[8,12], index: 0, kind: input, shape index: {}]   ;;  %s480_s1 = inlined_call_operand.hbm [shape: f32[72,256], index: 1, kind: input, shape index: {}]   ;;  %s481_s2 = inlined_call_operand.hbm [shape: f32[8,256], index: 2, kind: output, shape index: {}]  }
   0x1   :  { %8 = vsyncpa [#allocation6], 0 }
   0x2   :  { %9 = vsyncpa [#allocation4], 0  ;;  %s15_s11 = sshll.u32 %s479_s0, 4  ;;  %s403_s12 = smov [#allocation2]   ;;  %s16_s11 = int_to_ptr.hbm [resolvable:$true] %s15_s11 }
   0x3   :  { %s17_s13 = sshll.u32 %s403_s12, 4  ;;  %s25_s16 = sshll.u32 %s480_s1, 4  ;;  %s18_s13 = int_to_ptr.vmem [resolvable:$true] %s17_s13  ;;  %s26_s16 = int_to_ptr.hbm [resolvable:$true] %s25_s16 }
   0x4   :  { %20 = dma.hbm_to_vmem [thread:$0]  %s16_s11, 128, %s18_s13, [#allocation3]  }
   0x5   :  { %s404_s17 = smov [#allocation5]   ;;  %s405_s19 = smov 256  }
   0x6   :  { %s27_s18 = sshll.u32 %s404_s17, 4  ;;  %s406_s20 = smov 16   ;;  %s28_s18 = int_to_ptr.vmem [resolvable:$true] %s27_s18 }
   0x7   :  { %33 = dma.hbm_to_vmem [thread:$0]  %s26_s16, 2304, %s28_s18, [#allocation6], %s405_s19, %s405_s19, %s406_s20  }
   0x8   :  { %397 = dma.done.wait [#allocation3], 128  }
   0x9   :  { %398 = vsyncadd [#allocation3], 4294967168 }
   0xa   :  { %399 = dma.done.wait [#allocation6], 2304  }
   0xb   :  { %400 = vsyncadd [#allocation6], 4294964992  ;;  %v407_v0 = vmov 2   ;;  %v408_v1 = vmov 0   ;;  %v409_v2 = vmov 4   ;;  %v446_v3 = vld [vmem:[#allocation2] sm:$0xff] }
   0xc   :  { %299 = vset.pattern.permute.xlu1 %v407_v0  ;;  %297 = vset.pattern.permute.xlu0 %v408_v1  ;;  %v410_v4 = vmov 3   ;;  %v411_v5 = vmov 1   ;;  %v412_v6 = vmov 5   ;;  %v413_v7 = vmov 6   ;;  %v43_v14 = vld [vmem:[#allocation5] sm:$0xff]  ;;  %s417_s0 = smov 10  }
   0xd   :  { %301 = vset.pattern.permute.xlu2 %v409_v2  ;;  %61 = vperm.xlu1 %299, %v446_v3   ;;  %v414_v8 = vmov 8   ;;  %v415_v9 = vmov 7   ;;  %v416_v10 = vmov 9   ;;  %v51_v15 = vperm.slane %v43_v14, 0  ;;  %v44_v35 = vld [vmem:[#allocation5 + $0x10] sm:$0x3] }
   0xe   :  { %48 = vperm.xlu0 %297, %v446_v3   ;;  %75 = vperm.xlu2 %301, %v446_v3   ;;  %v57_v16 = vperm.slane %v43_v14, 1  ;;  %v64_v18 = vperm.slane %v43_v14, 2  ;;  %v71_v22 = vperm.slane %v43_v14, 3  ;;  %v78_v25 = vperm.slane %v43_v14, 4  ;;  %v45_v51 = vld [vmem:[#allocation5 + $0x20] ss:$0 sm:$0xff] }
   0xf   :  { %v85_v29 = vperm.slane %v43_v14, 5  ;;  %v92_v30 = vperm.slane %v43_v14, 6  ;;  %v99_v33 = vperm.slane %v43_v14, 7  ;;  %v106_v42 = vperm.slane %v44_v35, 0  ;;  %v118_v56 = vld [vmem:[#allocation5 + $0x30] sm:$0x1f] }
  0x10   :  { %v113_v47 = vperm.slane %v44_v35, 1  ;;  %v125_v57 = vperm.slane %v118_v56, 0  ;;  %v131_v58 = vperm.slane %v118_v56, 1  ;;  %v138_v59 = vperm.slane %v118_v56, 2  ;;  %s418_s1 = smov 8   ;;  %s421_s21 = smov [#allocation7]  }
  0x11   :  { %v171_v35 = vld [vmem:[#allocation5 + $0x60] ss:$0 sm:$0xff]  ;;  %s265_s22 = sshll.u32 %s421_s21, 4  ;;  %s267_s25 = sshll.u32 %s481_s2, 4  ;;  %vm258_vm0 = vcmask 31744   ;;  %s266_s22 = int_to_ptr.vmem [resolvable:$true] %s265_s22  ;;  %s268_s25 = int_to_ptr.hbm [resolvable:$true] %s267_s25 }
  0x15   :  { %300 = vset.pattern.permute.xlu1 %v410_v4 }
  0x16   :  { %298 = vset.pattern.permute.xlu0 %v411_v5  ;;  %68 = vperm.xlu1 %300, %v446_v3  }
  0x17   :  { %54 = vperm.xlu0 %298, %v446_v3   ;;  %302 = vset.pattern.permute.xlu2 %v412_v6 }
  0x18   :  { %82 = vperm.xlu2 %302, %v446_v3  }
  0x1e   :  { %303 = vset.pattern.permute.xlu1 %v413_v7 }
  0x1f   :  { %305 = vset.pattern.permute.xlu0 %v414_v8  ;;  %89 = vperm.xlu1 %303, %v446_v3   ;;  %v145_v8 = vperm.slane %v118_v56, 3 }
  0x20   :  { %103 = vperm.xlu0 %305, %v446_v3   ;;  %304 = vset.pattern.permute.xlu2 %v415_v9 }
  0x21   :  { %96 = vperm.xlu2 %304, %v446_v3  }
  0x27   :  { %306 = vset.pattern.permute.xlu1 %v416_v10 }
  0x28   :  { %310 = vset.pattern.permute.xlu0 %v410_v4  ;;  %110 = vperm.xlu1 %306, %v446_v3  }
  0x29   :  { %307 = vset.pattern.permute.xlu2 %v408_v1 }
  0x30   :  { %308 = vset.pattern.permute.xlu1 %v411_v5 }
  0x68   :  { %v76_v11 = vpop.permute.xlu2 %75 }
  0x69   :  { %v79_v31 = vmul.f32 %v78_v25, %v76_v11  ;;  %v152_v11 = vperm.slane %v118_v56, 4  ;;  %v191_v56 = vld [vmem:[#allocation5 + $0x80] ss:$8 sm:$0x3] }
  0x72   :  { %v83_v17 = vpop.permute.xlu2 %82 }
  0x73   :  { %v86_v37 = vmul.f32 %v85_v29, %v83_v17 }
  0x7b   :  { %v97_v34 = vpop.permute.xlu2 %96 }
  0x7c   :  { %v100_v41 = vmul.f32 %v99_v33, %v97_v34 }
  0x7f   :  { %v62_v12 = vpop.permute.xlu1 %61 }
  0x80   :  { %v49_v13 = vpop.permute.xlu0 %48  ;;  %v65_v24 = vmul.f32 %v64_v18, %v62_v12 }
  0x81   :  { %v52_v21 = vmul.f32 %v51_v15, %v49_v13 }
  0x88   :  { %v69_v19 = vpop.permute.xlu1 %68 }
  0x89   :  { %v55_v20 = vpop.permute.xlu0 %54  ;;  %v72_v27 = vmul.f32 %v71_v22, %v69_v19  ;;  %v419_v22 = vmov 11  }
  0x8a   :  { %v58_v23 = vmul.f32 %v57_v16, %v55_v20 }
  0x8c   :  { %v59_v26 = vadd.f32 %v58_v23, %v52_v21  ;;  %v420_v23 = vmov 10  }
  0x8e   :  { %v66_v28 = vadd.f32 %v65_v24, %v59_v26 }
  0x90   :  { %v73_v32 = vadd.f32 %v72_v27, %v66_v28  ;;  %v170_v28 = vld [vmem:[#allocation5 + $0x50] sm:$0x3] }
  0x91   :  { %v90_v38 = vpop.permute.xlu1 %89  ;;  %v177_v29 = vperm.slane %v170_v28, 0 }
  0x92   :  { %v80_v36 = vadd.f32 %v79_v31, %v73_v32  ;;  %v93_v39 = vmul.f32 %v92_v30, %v90_v38  ;;  %v104_v43 = vpop.permute.xlu0 %103  ;;  %v183_v30 = vperm.slane %v170_v28, 1 }
  0x93   :  { %v107_v46 = vmul.f32 %v106_v42, %v104_v43 }
  0x94   :  { %v87_v40 = vadd.f32 %v86_v37, %v80_v36 }
  0x96   :  { %v94_v44 = vadd.f32 %v93_v39, %v87_v40  ;;  %v189_v39 = vld [vmem:[#allocation5 + $0x78] sm:$0x1f] }
  0x97   :  { %v206_v43 = vperm.slane %v189_v39, 1 }
  0x98   :  { %v101_v45 = vadd.f32 %v100_v41, %v94_v44  ;;  %v198_v41 = vperm.slane %v189_v39, 0 }
  0x9a   :  { %v111_v48 = vpop.permute.xlu1 %110  ;;  %v108_v49 = vadd.f32 %v107_v46, %v101_v45 }
  0x9b   :  { %v114_v50 = vmul.f32 %v113_v47, %v111_v48  ;;  %v216_v47 = vperm.slane %v189_v39, 2 }
  0x9d   :  { %v115_v52 = vadd.f32 %v114_v50, %v108_v49 }
  0x9f   :  { %v116_v53 = vadd.f32 %v115_v52, %v45_v51  ;;  %v236_v52 = vperm.slane %v189_v39, 4 }
  0xa1   :  { %v117_v54 = vmax.f32 %v116_v53, 0.0 }
  0xa3   :  { %142 = vperm.xlu0 %310, %v117_v54   ;;  %128 = vperm.xlu1 %308, %v117_v54  }
  0xa4   :  { %122 = vperm.xlu2 %307, %v117_v54  }
  0xab   :  { %311 = vset.pattern.permute.xlu1 %v409_v2  ;;  %313 = vset.pattern.permute.xlu0 %v419_v22 }
  0xac   :  { %309 = vset.pattern.permute.xlu2 %v407_v0  ;;  %149 = vperm.xlu1 %311, %v117_v54  }
  0xad   :  { %135 = vperm.xlu2 %309, %v117_v54  }
  0xb4   :  { %314 = vset.pattern.permute.xlu1 %v408_v1  ;;  %v119_v1 = vld [vmem:[#allocation5 + $0x40] ss:$0 sm:$0xff] }
  0xb5   :  { %312 = vset.pattern.permute.xlu2 %v420_v23 }
  0xfe   :  { %v123_v55 = vpop.permute.xlu2 %122 }
  0xff   :  { %v126_v61 = vmul.f32 %v125_v57, %v123_v55 }
 0x107   :  { %v136_v62 = vpop.permute.xlu2 %135 }
 0x108   :  { %v139_v7 = vmul.f32 %v138_v59, %v136_v62 }
 0x115   :  { %v129_v60 = vpop.permute.xlu1 %128  ;;  %v143_v9 = vpop.permute.xlu0 %142 }
 0x116   :  { %v132_v63 = vmul.f32 %v131_v58, %v129_v60  ;;  %v146_v12 = vmul.f32 %v145_v8, %v143_v9 }
 0x118   :  { %v133_v6 = vadd.f32 %v132_v63, %v126_v61 }
 0x11a   :  { %v140_v10 = vadd.f32 %v139_v7, %v133_v6  ;;  %v242_v6 = vperm.slane %v191_v56, 0  ;;  %v243_v7 = vperm.slane %v191_v56, 1 }
 0x11c   :  { %v147_v14 = vadd.f32 %v146_v12, %v140_v10 }
 0x11e   :  { %v150_v13 = vpop.permute.xlu1 %149 }
 0x11f   :  { %v153_v15 = vmul.f32 %v152_v11, %v150_v13 }
 0x121   :  { %v154_v16 = vadd.f32 %v153_v15, %v147_v14 }
 0x123   :  { %v155_v17 = vadd.f32 %v154_v16, %v119_v1 }
 0x125   :  { %v466_v18 = vmax.f32 %v155_v17, 0.0 }
 0x127   :  { %166 = vrot.lane.b32.xlu1 %v466_v18, %s417_s0  ;;  %v157_v19 = vmul.f32 0.5, %v466_v18 }
 0x129   :  { %v158_v20 = vmul.f32 1.442695, %v157_v19 }
 0x12b   :  { %319 = vpow2.f32 %v158_v20 }
 0x131   :  { %v320_v21 = vpop.eup %319 }
 0x132   :  { %161 = vrot.lane.b32.xlu2 %v320_v21, %s418_s1 }
 0x18c   :  { %v162_v24 = vpop.permute.xlu2 %161 }
 0x18d   :  { %v164_v25 = vmul.f32 %v162_v24, %v446_v3 }
 0x199   :  { %v167_v26 = vpop.permute.xlu1 %166 }
 0x19a   :  { %v169_v27 = vadd.f32 %v167_v26, %v164_v25 }
 0x19c   :  { %180 = vperm.xlu0 %313, %v169_v27   ;;  %174 = vperm.xlu2 %312, %v169_v27  }
 0x1a4   :  { %318 = vset.pattern.permute.xlu0 %v409_v2  ;;  %315 = vset.pattern.permute.xlu2 %v411_v5  ;;  %v188_v5 = vld [vmem:[#allocation5 + $0x70] sm:$0x1f] }
 0x1a5   :  { %v197_v40 = vperm.slane %v188_v5, 0  ;;  %v205_v42 = vperm.slane %v188_v5, 1  ;;  %v215_v46 = vperm.slane %v188_v5, 2  ;;  %v225_v50 = vperm.slane %v188_v5, 3 }
 0x1f6   :  { %v175_v31 = vpop.permute.xlu2 %174 }
 0x1f7   :  { %v178_v33 = vmul.f32 %v177_v29, %v175_v31 }
 0x20e   :  { %v181_v32 = vpop.permute.xlu0 %180 }
 0x20f   :  { %v184_v34 = vmul.f32 %v183_v30, %v181_v32 }
 0x211   :  { %v185_v36 = vadd.f32 %v184_v34, %v178_v33 }
 0x213   :  { %v186_v37 = vadd.f32 %v185_v36, %v171_v35 }
 0x215   :  { %v187_v38 = vmax.f32 %v186_v37, 0.0 }
 0x217   :  { %232 = vperm.xlu0 %318, %v187_v38   ;;  %202 = vperm.xlu2 %315, %v187_v38  }
 0x218   :  { %194 = vperm.xlu1 %314, %v187_v38  }
 0x21f   :  { %317 = vset.pattern.permute.xlu2 %v410_v4  ;;  %v226_v4 = vperm.slane %v189_v39, 3 }
 0x220   :  { %316 = vset.pattern.permute.xlu1 %v407_v0  ;;  %222 = vperm.xlu2 %317, %v187_v38   ;;  %v235_v0 = vperm.slane %v188_v5, 4 }
 0x221   :  { %212 = vperm.xlu1 %316, %v187_v38  }
 0x271   :  { %v203_v2 = vpop.permute.xlu2 %202 }
 0x272   :  { %v207_v48 = vmul.f32 %v205_v42, %v203_v2  ;;  %v208_v49 = vmul.f32 %v206_v43, %v203_v2 }
 0x27a   :  { %v223_v51 = vpop.permute.xlu2 %222 }
 0x27b   :  { %v227_v60 = vmul.f32 %v225_v50, %v223_v51  ;;  %v228_v61 = vmul.f32 %v226_v4, %v223_v51 }
 0x289   :  { %v233_v59 = vpop.permute.xlu0 %232 }
 0x28a   :  { %v195_v3 = vpop.permute.xlu1 %194  ;;  %v237_v8 = vmul.f32 %v235_v0, %v233_v59  ;;  %v238_v9 = vmul.f32 %v236_v52, %v233_v59 }
 0x28b   :  { %v199_v44 = vmul.f32 %v197_v40, %v195_v3  ;;  %v200_v45 = vmul.f32 %v198_v41, %v195_v3 }
 0x28d   :  { %v209_v54 = vadd.f32 %v207_v48, %v199_v44  ;;  %v210_v55 = vadd.f32 %v208_v49, %v200_v45 }
 0x293   :  { %v213_v53 = vpop.permute.xlu1 %212 }
 0x294   :  { %v217_v57 = vmul.f32 %v215_v46, %v213_v53  ;;  %v218_v58 = vmul.f32 %v216_v47, %v213_v53 }
 0x296   :  { %v219_v62 = vadd.f32 %v217_v57, %v209_v54  ;;  %v220_v63 = vadd.f32 %v218_v58, %v210_v55 }
 0x298   :  { %v229_v10 = vadd.f32 %v227_v60, %v219_v62  ;;  %v230_v11 = vadd.f32 %v228_v61, %v220_v63 }
 0x29a   :  { %v239_v12 = vadd.f32 %v237_v8, %v229_v10  ;;  %v240_v13 = vadd.f32 %v238_v9, %v230_v11 }
 0x29c   :  { %v246_v14 = vadd.f32 %v242_v6, %v239_v12  ;;  %v247_v15 = vadd.f32 %v243_v7, %v240_v13 }
 0x29e   :  { %v248_v1 = vmul.f32 0.5, %v246_v14  ;;  %v249_v16 = vmul.f32 0.5, %v247_v15 }
 0x2a0   :  { %321 = vtanh.f32 %v248_v1 }
 0x2a1   :  { %323 = vtanh.f32 %v249_v16 }
 0x2a6   :  { %v322_v17 = vpop.eup %321 }
 0x2a7   :  { %v324_v19 = vpop.eup %323  ;;  %v252_v20 = vmul.f32 0.5, %v322_v17 }
 0x2a8   :  { %v253_v21 = vmul.f32 0.5, %v324_v19 }
 0x2a9   :  { %v254_v22 = vadd.f32 0.5, %v252_v20 }
 0x2aa   :  { %v255_v23 = vadd.f32 0.5, %v253_v21 }
 0x2ab   :  { %256 = vst [vmem:[#allocation7] sm:$0xff] %v254_v22 }
 0x2ac   :  { %257 = vst [vmem:[#allocation7 + $0x8] sm:$0xff] %v255_v23 }
 0x2ad   :  { %259 = vst.msk [vmem:[#allocation7] sm:$0xff] %vm258_vm0, %v466_v18 }
 0x2ae   :  { %270 = dma.vmem_to_hbm [thread:$0]  %s266_s22, 256, %s268_s25, [#allocation4]  }
 0x2af   :  { %401 = dma.done.wait [#allocation4], 256  }
 0x2b0   :  { %402 = vsyncadd [#allocation4], 4294967040 }
 0x2b1   :  { %275 = vsyncpa [#allocation3], 1 }
 0x2b2   :  { %276 = vsyncpa [#allocation6], 1 }
 0x2b3   :  { %277 = vsyncpa [#allocation4], 1 }

</bundles_post_ra>
